<compile_context>
chip_gen: v5e
topology: v5e:2x2
jax: 0.10.0
libtpu: 0.0.40
codegen_flags: <defaults>
</compile_context>

<pallas_src>
import functools

import jax
import jax.numpy as jnp
from jax.experimental import pallas as pl
from jax.experimental.pallas import tpu as pltpu


# --------------------------------------------------------------------------
# Pass 1: diag[r] = im[r] . s[r]  (row-wise dot; VPU mul + lane reduce, off MXU)
# --------------------------------------------------------------------------
def _diag_kernel(im_ref, s_ref, drow_ref):
    p = im_ref[...].astype(jnp.float32) * s_ref[...].astype(jnp.float32)
    drow_ref[...] = jnp.sum(p, axis=1, keepdims=True)          # (td, 1)


# --------------------------------------------------------------------------
# Pass 2: tiled hinge-cost reduction.
# --------------------------------------------------------------------------
def _hinge_kernel(margin_ref, im_ref, s_ref, drow_ref, dcol_ref, *refs,
                  max_violation, v2t, t2v, tm, tn):
    has_colmax = max_violation and t2v
    if has_colmax:
        out_part_ref, out_colmax_ref, acc_ref = refs
    else:
        out_part_ref, acc_ref = refs
        out_colmax_ref = None

    i = pl.program_id(0)
    j = pl.program_id(1)
    last_j = pl.num_programs(1) - 1
    margin = margin_ref[0]                                      # SMEM scalar

    @pl.when(j == 0)
    def _():
        acc_ref[...] = jnp.zeros_like(acc_ref)

    # scores[r, c] = im_row[r] . s_col[c]; contraction on dim 1 of both operands
    # keeps `s` un-transposed (no XLU transpose feeding the MXU).  Operands stay
    # in their input dtype; accumulation is f32.
    scores = jax.lax.dot_general(
        im_ref[...], s_ref[...],
        dimension_numbers=(((1,), (1,)), ((), ())),
        preferred_element_type=jnp.float32)                     # (tm, tn)

    base = margin + scores          # hoisted once, shared by both directions

    if max_violation:
        # Reference zeroes the diagonal *before* the row/col max -> keep a
        # sentinel mask here (hinge clamps it to 0).  Global row/col indices.
        row = jax.lax.broadcasted_iota(jnp.int32, (tm, tn), 0) + i * tm
        col = jax.lax.broadcasted_iota(jnp.int32, (tm, tn), 1) + j * tn
        base = jnp.where(row == col, jnp.float32(-3.0e38), base)
    # else: no mask — diagonal contribution removed analytically in the wrapper.

    if v2t:
        cost_s = jnp.maximum(base - drow_ref[...], 0.0)         # (tm, tn)
        if max_violation:
            acc_ref[...] = jnp.maximum(
                acc_ref[...], jnp.max(cost_s, axis=1, keepdims=True))
        else:
            acc_ref[...] += jnp.sum(cost_s, axis=1, keepdims=True)

    if t2v:
        cost_im = jnp.maximum(base - dcol_ref[...], 0.0)        # (tm, tn)
        if max_violation:
            # Per-(i, j) column max over this tile's rows; cross-row-tile max
            # is finalized outside (row axis is "parallel").
            out_colmax_ref[...] = jnp.max(
                cost_im, axis=0, keepdims=True).reshape(1, 1, tn)
        else:
            acc_ref[...] += jnp.sum(cost_im, axis=1, keepdims=True)

    @pl.when(j == last_j)
    def _():
        out_part_ref[...] = jnp.sum(acc_ref[...]).reshape(out_part_ref.shape)


def _pick_tile(n):
    for t in (512, 256, 128):
        if n % t == 0:
            return t
    return n   # single-tile fallback (whole N x N score tile must fit VMEM)


def triplet_loss(s, im, *, margin=0.0, max_violation=False,
                 cost_style="sum", direction="all",
                 block_rows=None, block_cols=None):
    """Pallas equivalent of TripletLoss(margin, measure=cosine, ...).forward(s, im)."""
    assert s.shape == im.shape and s.ndim == 2
    assert direction in ("v2t", "t2v", "all")
    n, d = im.shape
    v2t = direction in ("v2t", "all")
    t2v = direction in ("t2v", "all")

    tm = block_rows or _pick_tile(n)
    tn = block_cols or _pick_tile(n)
    assert n % tm == 0 and n % tn == 0
    gi, gj = n // tm, n // tn
    if gi > 1:
        assert tm % 8 == 0
    if gj > 1:
        assert tn % 128 == 0

    # ---- pass 1: the score diagonal, in both broadcast layouts ----
    drow = pl.pallas_call(
        _diag_kernel,
        out_shape=jax.ShapeDtypeStruct((n, 1), jnp.float32),
        grid=(gi,),
        in_specs=[pl.BlockSpec((tm, d), lambda i: (i, 0)),
                  pl.BlockSpec((tm, d), lambda i: (i, 0))],
        out_specs=pl.BlockSpec((tm, 1), lambda i: (i, 0)),
        compiler_params=pltpu.CompilerParams(
            dimension_semantics=("parallel",)),
    )(im, s)
    dcol = drow.reshape(1, n)          # layout plumbing only (lane-dense row)

    # ---- pass 2: tiled hinge costs + reduction ----
    margin_arr = jnp.asarray([margin], dtype=jnp.float32)
    has_colmax = max_violation and t2v

    out_shape = [jax.ShapeDtypeStruct((gi, 1, 1), jnp.float32)]
    out_specs = [pl.BlockSpec((1, 1, 1), lambda i, j: (i, 0, 0))]
    if has_colmax:
        out_shape.append(jax.ShapeDtypeStruct((gi, 1, n), jnp.float32))
        out_specs.append(pl.BlockSpec((1, 1, tn), lambda i, j: (i, 0, j)))

    kernel = functools.partial(_hinge_kernel, max_violation=max_violation,
                               v2t=v2t, t2v=t2v, tm=tm, tn=tn)

    itemsize = jnp.dtype(im.dtype).itemsize
    ndir = int(v2t) + int(t2v)
    flops = 2 * n * n * d + ndir * 4 * n * n
    bytes_accessed = (gi + 1) * n * d * itemsize + 12 * n + 4 * gi * (1 + n)
    vmem_est = 2 * (4 * (tm + tn) * d * itemsize      # double-buffered im/s tiles
                    + 8 * tm * tn * 4                 # scores/base/hinge temps
                    + 8 * (tm + tn) + tm * 4 + 4096)
    vmem_limit = int(min(max(vmem_est, 32 * 1024 * 1024), 100 * 1024 * 1024))

    outs = pl.pallas_call(
        kernel,
        out_shape=tuple(out_shape),
        grid=(gi, gj),
        in_specs=[
            pl.BlockSpec(memory_space=pltpu.MemorySpace.SMEM),   # margin
            pl.BlockSpec((tm, d), lambda i, j: (i, 0)),          # im row tile
            pl.BlockSpec((tn, d), lambda i, j: (j, 0)),          # s  col tile
            pl.BlockSpec((tm, 1), lambda i, j: (i, 0)),          # diag (rows)
            pl.BlockSpec((1, tn), lambda i, j: (0, j)),          # diag (cols)
        ],
        out_specs=tuple(out_specs),
        scratch_shapes=[pltpu.VMEM((tm, 1), jnp.float32)],
        compiler_params=pltpu.CompilerParams(
            dimension_semantics=("parallel", "arbitrary"),
            vmem_limit_bytes=vmem_limit),
        cost_estimate=pl.CostEstimate(flops=flops, transcendentals=0,
                                      bytes_accessed=int(bytes_accessed)),
    )(margin_arr, im, s, drow, dcol)

    # ---- tiny finalize (O(GI + GI*N)); cross-row-tile reductions can't live
    # in per-core scratch when the row axis is parallel. ----
    out_part = outs[0]
    nf = jnp.float32(n)
    m_pos = jnp.maximum(jnp.float32(margin), 0.0)

    if not max_violation:
        total_sum = jnp.sum(out_part) - ndir * nf * m_pos   # analytic diag fix
        if cost_style == "sum":
            return total_sum
        return total_sum / (nf * nf)

    total = jnp.float32(0.0)
    if v2t:
        sum_s = jnp.sum(out_part)
        total = total + (sum_s if cost_style == "sum" else sum_s / nf)
    if t2v:
        colmax = jnp.max(outs[1], axis=0)                   # (1, N)
        sum_im = jnp.sum(colmax)
        total = total + (sum_im if cost_style == "sum" else sum_im / nf)
    return total


# --------------------------------------------------------------------------
# Pure-JAX reference (mirrors the PyTorch forward).
# --------------------------------------------------------------------------
def _reference(s, im, margin=0.0, max_violation=False,
               cost_style="sum", direction="all"):
    scores = im @ s.T
    diag = jnp.diag(scores).reshape(-1, 1)
    eye = jnp.eye(scores.shape[0], dtype=bool)
    tot_s = jnp.float32(0.0)
    tot_im = jnp.float32(0.0)
    if direction in ("v2t", "all"):
        cs = jnp.maximum(margin + scores - diag, 0.0)
        cs = jnp.where(eye, 0.0, cs)
        if max_violation:
            cs = cs.max(axis=1)
        tot_s = cs.sum() if cost_style == "sum" else cs.mean()
    if direction in ("t2v", "all"):
        ci = jnp.maximum(margin + scores - diag.T, 0.0)
        ci = jnp.where(eye, 0.0, ci)
        if max_violation:
            ci = ci.max(axis=0)
        tot_im = ci.sum() if cost_style == "sum" else ci.mean()
    return tot_s + tot_im


if __name__ == "__main__":
    key = jax.random.PRNGKey(0)
    k_s, k_im = jax.random.split(key)

    def make(n, d):
        a = jax.random.normal(k_s, (n, d), dtype=jnp.float32)
        b = jax.random.normal(k_im, (n, d), dtype=jnp.float32)
        a = a / jnp.linalg.norm(a, axis=1, keepdims=True)
        b = b / jnp.linalg.norm(b, axis=1, keepdims=True)
        return a, b

    cases = []
    # Multi-tile grid: batch 256, dim 128 -> 2x2 tiles of 128 (margin near 1 so
    # the hinge actually fires on normalized embeddings).
    s256, im256 = make(256, 128)
    for cfg in (dict(margin=1.0, max_violation=False, cost_style="sum", direction="all"),
                dict(margin=0.95, max_violation=True, cost_style="sum", direction="all"),
                dict(margin=1.0, max_violation=False, cost_style="mean", direction="v2t"),
                dict(margin=0.9, max_violation=True, cost_style="mean", direction="t2v")):
        cases.append((s256, im256, dict(cfg, block_rows=128, block_cols=128)))
    # Auto-picked single tile (256) path.
    cases.append((s256, im256,
                  dict(margin=0.95, max_violation=True, cost_style="sum", direction="all")))
    # Tiny-batch single-tile fallback.
    s8, im8 = make(8, 128)
    cases.append((s8, im8,
                  dict(margin=0.9, max_violation=True, cost_style="sum", direction="all")))

    for s_a, im_a, cfg in cases:
        ref_cfg = {k: v for k, v in cfg.items()
                   if k not in ("block_rows", "block_cols")}
        loss = triplet_loss(s_a, im_a, **cfg)
        jax.block_until_ready(loss)
        ref = _reference(s_a, im_a, **ref_cfg)
        assert jnp.allclose(loss, ref, rtol=5e-4, atol=1e-3), (ref_cfg, loss, ref)

    print("KERNEL_OK")
</pallas_src>

<mosaic_0001>
module attributes {stable_mosaic.version = 11 : i64} {
  func.func @_diag_kernel(%arg0: i32, %arg1: memref<128x128xf32, #tpu.memory_space<vmem>>, %arg2: memref<128x128xf32, #tpu.memory_space<vmem>>, %arg3: memref<128x1xf32, #tpu.memory_space<vmem>>) attributes {dimension_semantics = [#tpu.dimension_semantics<parallel>], iteration_bounds = array<i64: 2>, scalar_prefetch = 0 : i64, scratch_operands = 0 : i64, tpu.core_type = #tpu.core_type<tc>, window_params = [{transform_indices = @transform_0, window_bounds = array<i64: 128, 128>}, {transform_indices = @transform_1, window_bounds = array<i64: 128, 128>}, {transform_indices = @transform_2, window_bounds = array<i64: 128, 1>}]} {
    %c0 = arith.constant 0 : index
    %c0_0 = arith.constant 0 : index
    %0 = vector.load %arg1[%c0, %c0_0] : memref<128x128xf32, #tpu.memory_space<vmem>>, vector<128x128xf32>
    %c0_1 = arith.constant 0 : index
    %c0_2 = arith.constant 0 : index
    %1 = vector.load %arg2[%c0_1, %c0_2] : memref<128x128xf32, #tpu.memory_space<vmem>>, vector<128x128xf32>
    %2 = arith.mulf %0, %1 : vector<128x128xf32>
    %cst = arith.constant dense<0.000000e+00> : vector<128xf32>
    %3 = vector.multi_reduction <add>, %2, %cst [1] : vector<128x128xf32> to vector<128xf32>
    %4 = vector.shape_cast %3 : vector<128xf32> to vector<128x1xf32>
    %c0_3 = arith.constant 0 : index
    %c0_4 = arith.constant 0 : index
    %5 = vector.load %arg3[%c0_3, %c0_4] : memref<128x1xf32, #tpu.memory_space<vmem>>, vector<128x1xf32>
    tpu.vector_store %arg3[%c0_3, %c0_4], %4 {strides = array<i32>} : memref<128x1xf32, #tpu.memory_space<vmem>>, vector<128x1xf32>,
    return
  }
  func.func @transform_0(%arg0: i32) -> (i32, i32) {
    %c0_i32 = arith.constant 0 : i32
    %c0_i32_0 = arith.constant 0 : i32
    return %arg0, %c0_i32 : i32, i32
  }
  func.func @transform_1(%arg0: i32) -> (i32, i32) {
    %c0_i32 = arith.constant 0 : i32
    %c0_i32_0 = arith.constant 0 : i32
    return %arg0, %c0_i32 : i32, i32
  }
  func.func @transform_2(%arg0: i32) -> (i32, i32) {
    %c0_i32 = arith.constant 0 : i32
    %c0_i32_0 = arith.constant 0 : i32
    return %arg0, %c0_i32 : i32, i32
  }
}

</mosaic_0001>

<bundles_post_ra>
// kernel: tpu_custom_call.1
= control target key start
LH: loop header
LB: loop body
LE: loop exit
PB: predicated region body
PF: predicated region fallthrough
CT: control target
= control target key end

     0   :  { %7 = vsyncpa [#allocation3], 0  ;;  %s781_s0 = inlined_call_operand.hbm [shape: f32[256,128], index: 0, kind: input, shape index: {}]   ;;  %s782_s1 = inlined_call_operand.hbm [shape: f32[256,128], index: 1, kind: input, shape index: {}]   ;;  %s783_s2 = inlined_call_operand.vmem [shape: f32[256,1], index: 2, kind: output, shape index: {}]  }
   0x1   :  { %9 = vsyncpa [#allocation3 + $0x1], 0 }
   0x2   :  { %10 = vsyncpa [#allocation5], 0 }
   0x3   :  { %12 = vsyncpa [#allocation5 + $0x1], 0  ;;  %s580_s9 = smov 0   ;;  %s582_s10 = smov 0  }
   0x4   :  { %s584_s11 = smov 0   ;;  %s586_s12 = smov 0  }
   0x5 LB: > { %s398_s13 = sadd.s32 4294967295, %s561_s12   ;;  %s600_s14 = sadd.s32 1, %s561_s12   ;;  %s561_s12 = sphi %s586_s12, %s791_s12   ;;  %s557_s11 = sphi %s584_s11, %s790_s11   ;;  %s553_s10 = sphi %s582_s10, %s789_s10   ;;  %s549_s9 = sphi %s580_s9, %s788_s9  }
   0x6   : > { %s22_s15 = ssub.s32 %s561_s12, %s600_s14  ;;  %s25_s16 = sadd.s32 1, %s557_s11 }
   0x7   : > { %p23_p0 = scmp.eq.s32.totalorder %s22_s15, 0  ;;  %p32_p1 = scmp.ne.s32.totalorder %s557_s11, %s553_s10 }
   0x8   : > { %p33_p2 = scmp.eq.s32.totalorder %s561_s12, 0  ;;  %p38_p3 = scmp.ne.s32.totalorder %s553_s10, %s549_s9 }
   0x9   : > { %s610_s17 = scalar_select %p23_p0, %s557_s11, %s25_s16  }
   0xa   : > { %p612_p4 = por %p33_p2, %p32_p1  ;;  %p39_p5 = scmp.eq.s32.totalorder %s398_s13, 0 }
   0xb   : > { %p428_p6 = scmp.lt.s32.totalorder %s561_s12, 2  ;;  %s624_s20 = sand.u32 1, %s557_s11  }
   0xc   : > { %p619_p7 = por %p39_p5, %p38_p3  ;;  %s402_s21 = sshll.u32 %s624_s20, 7 }
   0xd   : > { %s415_s22 = sshll.u32 %s561_s12, 7  ;;  %s118_s26 = scalar_lea.vmem [#allocation2], %s402_s21 }
   0xe   : > { %s123_s25 = scalar_lea.hbm %s781_s0, %s415_s22  ;;  %s126_s27 = sshll.u32 %s118_s26, 4  ;;  %s127_s27 = int_to_ptr.vmem [resolvable:$true] %s126_s27 }
   0xf   : > { %s124_s28 = sshll.u32 %s123_s25, 4  ;;  %p637_p8 = pnand %p428_p6, %p612_p4  ;;  %s125_s28 = int_to_ptr.hbm [resolvable:$true] %s124_s28 }
  0x10   : > { %p408_p9 = scmp.ge.s32.totalorder %s561_s12, 1  ;;  %s115_s30 = scalar_lea.sflag [#allocation3], %s624_s20 }
  0x11   : > { %s463_s3 = sshra.s32 %s125_s28, 4  ;;  %p467_p11 = pneg %p637_p8  ;;  %s464_s3 = int_to_ptr.hbm [resolvable:$true] %s463_s3 }
  0x12   : > { %s465_s4 = scalar_lea.hbm %s464_s3, 128  ;;  %s470_s7 = scalar_lea.hbm %s781_s0, 256 }
  0x13   : > { %p466_p10 = scmp.ne.s32.totalorder %s464_s3, %s465_s4  ;;  %p471_p0 = scmp.lt.s32.totalorder %s464_s3, %s781_s0 }
  0x14   : > { %p472_p1 = scmp.lt.s32.totalorder %s470_s7, %s465_s4 }
  0x15   : > { %p468_p12 = pnand %p467_p11, %p466_p10 }
  0x16   : > { %p473_p2 = por %p472_p1, %p471_p0 }
  0x17   : > { %p469_p13 = pneg %p468_p12 }
  0x19   : > { %p474_p3 = pnand %p473_p2, %p469_p13 }
  0x1b   : > { %477 = shalt.err (!%p474_p3)
}
  0x1c   : > { %s563_s15 = smov 128   ;;  %s564_s16 = smov 8  }
  0x1d   : > { %424 = dma.hbm_to_vmem [thread:$0]  (!%p637_p8), %s125_s28, 2048, %s127_s27, %s115_s30, %s563_s15, %s563_s15, %s564_s16  }
  0x1e   : > { %p156_p4 = scmp.lt.s32.totalorder %s561_s12, 3  ;;  %s145_s24 = scalar_lea.hbm %s782_s1, %s415_s22 }
  0x1f   : > { %s146_s26 = sshll.u32 %s145_s24, 4  ;;  %s140_s3 = scalar_lea.vmem [#allocation4], %s402_s21  ;;  %s147_s26 = int_to_ptr.hbm [resolvable:$true] %s146_s26 }
  0x20   : > { %p664_p5 = pnand %p408_p9, %p156_p4  ;;  %s148_s4 = sshll.u32 %s140_s3, 4  ;;  %s149_s4 = int_to_ptr.vmem [resolvable:$true] %s148_s4 }
  0x21   : > { %s137_s5 = scalar_lea.sflag [#allocation5], %s624_s20  ;;  %s493_s6 = sshra.s32 %s147_s26, 4  ;;  %s494_s6 = int_to_ptr.hbm [resolvable:$true] %s493_s6 }
  0x22   : > { %s495_s27 = scalar_lea.hbm %s494_s6, 128  ;;  %s500_s30 = scalar_lea.hbm %s782_s1, 256 }
  0x23   : > { %p496_p6 = scmp.ne.s32.totalorder %s494_s6, %s495_s27  ;;  %p501_p9 = scmp.lt.s32.totalorder %s494_s6, %s782_s1 }
  0x24   : > { %p502_p13 = scmp.lt.s32.totalorder %s500_s30, %s495_s27 }
  0x25   : > { %p498_p10 = pnand %p496_p6, %p467_p11 }
  0x26   : > { %p503_p0 = por %p502_p13, %p501_p9 }
  0x27   : > { %p499_p12 = pneg %p498_p10 }
  0x29   : > { %p504_p1 = pnand %p503_p0, %p499_p12 }
  0x2b   : > { %507 = shalt.err (!%p504_p1)
}
  0x2c   : > { %427 = dma.hbm_to_vmem [thread:$0]  (!%p637_p8), %s147_s26, 2048, %s149_s4, %s137_s5, %s563_s15, %s563_s15, %s564_s16  }
  0x2d   : > { %160 = sbr.rel (%p664_p5) target bundleno = 214 (0xd6), region = 28  ;;  %s162_s20 = sand.u32 (!%p664_p5), 1, %s553_s10  }
  0x2e   : > { %s409_s21 = sshll.u32 (!%p664_p5), %s162_s20, 7  ;;  %s163_s9 = scalar_lea.sflag (!%p664_p5), [#allocation3], %s162_s20 }
  0x2f   : > { %s685_s18 = scalar_lea.vmem (!%p664_p5), [#allocation2], %s409_s21 }
  0x32   : > { %540 = dma.done.wait (%p619_p7), %s163_s9, 2048  }
  0x33   : > { %542 = vsyncadd (%p619_p7), %s163_s9, 4294965248  ;;  %s173_s23 = scalar_lea.sflag [#allocation5], %s162_s20  ;;  %s691_s24 = scalar_lea.vmem [#allocation4], %s409_s21 }
  0x34   : > { %544 = dma.done.wait (%p619_p7), %s173_s23, 2048  }
  0x35   : > { %546 = vsyncadd (%p619_p7), %s173_s23, 4294965248  ;;  %v211_v0 = vld [vmem:[%s685_s18] sm:$0xff]  ;;  %v213_v5 = vld [vmem:[%s685_s18 + $0x10] sm:$0xff]  ;;  %s411_s19 = sshll.u32 %s398_s13, 4  ;;  %vm291_vm0 = vcmask 7168  }
  0x36   : > { %v227_v1 = vld [vmem:[%s691_s24] sm:$0xff]  ;;  %v229_v6 = vld [vmem:[%s691_s24 + $0x10] sm:$0xff]  ;;  %v212_v9 = vld [vmem:[%s685_s18 + $0x8] sm:$0xff]  ;;  %p206_p7 = scmp.lt.s32.totalorder %s411_s19, 31 }
  0x37   : > { %v215_v2 = vld [vmem:[%s685_s18 + $0x20] sm:$0xff]  ;;  %v243_v3 = vmul.f32 %v227_v1, %v211_v0  ;;  %v245_v8 = vmul.f32 %v229_v6, %v213_v5  ;;  %v228_v10 = vld [vmem:[%s691_s24 + $0x8] sm:$0xff]  ;;  %v214_v13 = vld [vmem:[%s685_s18 + $0x18] sm:$0xff] }
  0x38   : > { %v231_v4 = vld [vmem:[%s691_s24 + $0x20] sm:$0xff]  ;;  %v216_v11 = vld [vmem:[%s685_s18 + $0x28] sm:$0xff]  ;;  %v230_v14 = vld [vmem:[%s691_s24 + $0x18] sm:$0xff]  ;;  %v244_v15 = vmul.f32 %v228_v10, %v212_v9  ;;  %s793_s19 = smov (!%p206_p7, %s411_s19), 31 }
  0x39   : > { %v247_v7 = vmul.f32 %v231_v4, %v215_v2  ;;  %259 = vadd.xlane.f32.xlu0 %v243_v3  ;;  %263 = vadd.xlane.f32.xlu1 %v245_v8  ;;  %v232_v12 = vld [vmem:[%s691_s24 + $0x28] sm:$0xff]  ;;  %v246_v17 = vmul.f32 %v230_v14, %v214_v13  ;;  %v217_v18 = vld [vmem:[%s685_s18 + $0x30] sm:$0xff]  ;;  %v219_v20 = vld [vmem:[%s685_s18 + $0x40] sm:$0xff]  ;;  %s412_s29 = sshll.u32 %s793_s19, 3 }
  0x3a   : > { %v248_v16 = vmul.f32 %v232_v12, %v216_v11  ;;  %v233_v19 = vld [vmem:[%s691_s24 + $0x30] sm:$0xff]  ;;  %v235_v21 = vld [vmem:[%s691_s24 + $0x40] sm:$0xff]  ;;  %v218_v22 = vld [vmem:[%s685_s18 + $0x38] sm:$0xff]  ;;  %s734_s25 = scalar_lea.vmem %s783_s2, %s412_s29 }
  0x3b   : > { %267 = vadd.xlane.f32.xlu2 %v247_v7  ;;  %v234_v23 = vld [vmem:[%s691_s24 + $0x38] sm:$0xff]  ;;  %v249_v24 = vmul.f32 %v233_v19, %v217_v18  ;;  %v251_v25 = vmul.f32 %v235_v21, %v219_v20  ;;  %v220_v27 = vld [vmem:[%s685_s18 + $0x48] sm:$0xff]  ;;  %v221_v31 = vld [vmem:[%s685_s18 + $0x50] sm:$0xff] }
  0x3c   : > { %v250_v26 = vmul.f32 %v234_v23, %v218_v22  ;;  %v236_v28 = vld [vmem:[%s691_s24 + $0x48] sm:$0xff]  ;;  %v222_v29 = vld [vmem:[%s685_s18 + $0x58] sm:$0xff]  ;;  %v237_v32 = vld [vmem:[%s691_s24 + $0x50] sm:$0xff] }
  0x3d   : > { %v238_v30 = vld [vmem:[%s691_s24 + $0x58] sm:$0xff]  ;;  %v252_v33 = vmul.f32 %v236_v28, %v220_v27  ;;  %v253_v35 = vmul.f32 %v237_v32, %v221_v31  ;;  %v223_v36 = vld [vmem:[%s685_s18 + $0x60] sm:$0xff]  ;;  %v225_v38 = vld [vmem:[%s685_s18 + $0x70] sm:$0xff] }
  0x3e   : > { %v254_v34 = vmul.f32 %v238_v30, %v222_v29  ;;  %v239_v37 = vld [vmem:[%s691_s24 + $0x60] sm:$0xff]  ;;  %v241_v39 = vld [vmem:[%s691_s24 + $0x70] sm:$0xff]  ;;  %v224_v40 = vld [vmem:[%s685_s18 + $0x68] sm:$0xff] }
  0x3f   : > { %v240_v41 = vld [vmem:[%s691_s24 + $0x68] sm:$0xff]  ;;  %v255_v42 = vmul.f32 %v239_v37, %v223_v36  ;;  %v257_v43 = vmul.f32 %v241_v39, %v225_v38  ;;  %v226_v45 = vld [vmem:[%s685_s18 + $0x78] sm:$0xff] }
  0x40   : > { %v256_v44 = vmul.f32 %v240_v41, %v224_v40  ;;  %v242_v46 = vld [vmem:[%s691_s24 + $0x78] sm:$0xff] }
  0x41   : > { %261 = vadd.xlane.f32.xlu0 %v244_v15  ;;  %265 = vadd.xlane.f32.xlu1 %v246_v17  ;;  %v258_v47 = vmul.f32 %v242_v46, %v226_v45 }
  0x43   : > { %269 = vadd.xlane.f32.xlu2 %v248_v16 }
  0x49   : > { %271 = vadd.xlane.f32.xlu0 %v249_v24  ;;  %273 = vadd.xlane.f32.xlu1 %v250_v26 }
  0x4b   : > { %275 = vadd.xlane.f32.xlu2 %v251_v25 }
  0x51   : > { %277 = vadd.xlane.f32.xlu0 %v252_v33  ;;  %279 = vadd.xlane.f32.xlu1 %v253_v35 }
  0x53   : > { %281 = vadd.xlane.f32.xlu2 %v254_v34 }
  0x59   : > { %283 = vadd.xlane.f32.xlu0 %v255_v42  ;;  %285 = vadd.xlane.f32.xlu1 %v256_v44 }
  0x5b   : > { %287 = vadd.xlane.f32.xlu2 %v257_v43 }
  0x61   : > { %289 = vadd.xlane.f32.xlu0 %v258_v47 }
  0xac   : > { %v260_v48 = vpop.xlane.xlu0 %259  ;;  %v264_v50 = vpop.xlane.xlu1 %263 }
  0xad   : > { %292 = vst.msk [vmem:[%s734_s25] sm:$0xff] %vm291_vm0, %v260_v48 }
  0xae   : > { %v268_v49 = vpop.xlane.xlu2 %267  ;;  %294 = vst.msk [vmem:[%s734_s25 + $0x10] sm:$0xff] %vm291_vm0, %v264_v50 }
  0xaf   : > { %296 = vst.msk [vmem:[%s734_s25 + $0x20] sm:$0xff] %vm291_vm0, %v268_v49 }
  0xb4   : > { %v262_v51 = vpop.xlane.xlu0 %261  ;;  %v266_v53 = vpop.xlane.xlu1 %265 }
  0xb5   : > { %293 = vst.msk [vmem:[%s734_s25 + $0x8] sm:$0xff] %vm291_vm0, %v262_v51 }
  0xb6   : > { %v270_v52 = vpop.xlane.xlu2 %269  ;;  %295 = vst.msk [vmem:[%s734_s25 + $0x18] sm:$0xff] %vm291_vm0, %v266_v53 }
  0xb7   : > { %297 = vst.msk [vmem:[%s734_s25 + $0x28] sm:$0xff] %vm291_vm0, %v270_v52 }
  0xbc   : > { %v272_v54 = vpop.xlane.xlu0 %271  ;;  %v274_v56 = vpop.xlane.xlu1 %273 }
  0xbd   : > { %298 = vst.msk [vmem:[%s734_s25 + $0x30] sm:$0xff] %vm291_vm0, %v272_v54 }
  0xbe   : > { %v276_v55 = vpop.xlane.xlu2 %275  ;;  %299 = vst.msk [vmem:[%s734_s25 + $0x38] sm:$0xff] %vm291_vm0, %v274_v56 }
  0xbf   : > { %300 = vst.msk [vmem:[%s734_s25 + $0x40] sm:$0xff] %vm291_vm0, %v276_v55 }
  0xc4   : > { %v278_v57 = vpop.xlane.xlu0 %277  ;;  %v280_v59 = vpop.xlane.xlu1 %279 }
  0xc5   : > { %301 = vst.msk [vmem:[%s734_s25 + $0x48] sm:$0xff] %vm291_vm0, %v278_v57 }
  0xc6   : > { %v282_v58 = vpop.xlane.xlu2 %281  ;;  %302 = vst.msk [vmem:[%s734_s25 + $0x50] sm:$0xff] %vm291_vm0, %v280_v59 }
  0xc7   : > { %303 = vst.msk [vmem:[%s734_s25 + $0x58] sm:$0xff] %vm291_vm0, %v282_v58 }
  0xcc   : > { %v284_v60 = vpop.xlane.xlu0 %283  ;;  %v286_v62 = vpop.xlane.xlu1 %285 }
  0xcd   : > { %304 = vst.msk [vmem:[%s734_s25 + $0x60] sm:$0xff] %vm291_vm0, %v284_v60 }
  0xce   : > { %v288_v61 = vpop.xlane.xlu2 %287  ;;  %305 = vst.msk [vmem:[%s734_s25 + $0x68] sm:$0xff] %vm291_vm0, %v286_v62 }
  0xcf   : > { %306 = vst.msk [vmem:[%s734_s25 + $0x70] sm:$0xff] %vm291_vm0, %v288_v61 }
  0xd4   : > { %v290_v63 = vpop.xlane.xlu0 %289 }
  0xd5   : > { %307 = vst.msk [vmem:[%s734_s25 + $0x78] sm:$0xff] %vm291_vm0, %v290_v63 }
  0xd6 PF: > { %p15_p8 = scmp.ge.s32.totalorder %s600_s14, 4   ;;  %s788_s9 = smov %s553_s10 }
  0xd7   : > { %s789_s10 = smov %s557_s11  ;;  %s790_s11 = smov %s610_s17 }
  0xd8   : > { %s791_s12 = smov %s600_s14  ;;  %17 = sbr.rel (!%p15_p8) target bundleno = 5 (0x5), region = 81 }
  0xdd   :  { %330 = vsyncpa [#allocation3], 1 }
  0xde   :  { %332 = vsyncpa [#allocation3 + $0x1], 1 }
  0xdf   :  { %333 = vsyncpa [#allocation5], 1 }
  0xe0   :  { %335 = vsyncpa [#allocation5 + $0x1], 1 }

</bundles_post_ra>
